<compile_context>
chip_gen: v6e
topology: v6e:2x2x1
jax: 0.10.0
libtpu: 0.0.40
codegen_flags: <defaults>
</compile_context>

<pallas_src>
import functools

import jax
import jax.numpy as jnp
from jax.experimental import pallas as pl
from jax.experimental.pallas import tpu as pltpu

# PointNet hidden sizes (fixed by the reference implementation).
H1 = 64
H2 = 128


def _round_up(x: int, m: int) -> int:
    return ((x + m - 1) // m) * m


def _fused_edge_mlp_kernel(x_i_ref, x_j_ref, w1_ref, b1_ref, w2_ref, b2_ref,
                           w3_ref, b3_ref, out_ref, *, compute_dtype):
    """One (TILE_E, 8) tile: edge descriptor + 8->64->128->out MLP, fully fused."""
    xi = x_i_ref[...].astype(jnp.float32)
    xj = x_j_ref[...].astype(jnp.float32)

    # EdgeDescriptor_8: channels 0..2 -> xi - xj ; channels 3..7 -> log(xi / xj).
    # Single jnp.log over the whole tile (EUP slot), selected by channel index;
    # avoids sub-lane slicing/concat inside the kernel.  Values produced by the
    # log branch on channels 0..2 (possibly inf/nan) are masked out by where.
    ch = jax.lax.broadcasted_iota(jnp.int32, xi.shape, 1)
    feat = jnp.where(ch < 3, xi - xj, jnp.log(xi / xj))

    # Layer 1: (TILE_E, 8) @ (8, 64)   [K=8 MXU underutilization is negligible]
    h = jnp.dot(feat.astype(compute_dtype), w1_ref[...],
                preferred_element_type=jnp.float32) + b1_ref[...]
    h = jnp.maximum(h, 0.0)

    # Layer 2: (TILE_E, 64) @ (64, 128)
    h = jnp.dot(h.astype(compute_dtype), w2_ref[...],
                preferred_element_type=jnp.float32) + b2_ref[...]
    h = jnp.maximum(h, 0.0)

    # Layer 3: (TILE_E, 128) @ (128, out_pad)   -- no ReLU after the last layer.
    h = jnp.dot(h.astype(compute_dtype), w3_ref[...],
                preferred_element_type=jnp.float32) + b3_ref[...]

    out_ref[...] = h.astype(out_ref.dtype)


def edge_encoder_2dssg(descriptors, edges, w1, b1, w2, b2, w3, b3, *,
                       tile_e=2048, compute_dtype=jnp.bfloat16,
                       out_dtype=jnp.float32):
    """Fused EdgeDescriptor_8 + PointNet forward.

    Args:
      descriptors: (N, 8) float node descriptors (channels 3:8 must be > 0).
      edges:       (2, E) int edge indices; flow='target_to_source' =>
                   x_i = descriptors[edges[0]], x_j = descriptors[edges[1]].
      w1, w2, w3:  weights in [in, out] layout (pre-transposed from the PyTorch
                   Conv1d weight of shape [out, in, 1]).
      b1, b2, b3:  biases of shape [out].
    Returns:
      (E, out) edge features.
    """
    n_edges = int(edges.shape[1])
    out_dim = int(w3.shape[1])
    assert descriptors.shape[1] == 8
    assert w1.shape == (8, H1) and b1.shape == (H1,)
    assert w2.shape == (H1, H2) and b2.shape == (H2,)
    assert w3.shape[0] == H2 and b3.shape == (out_dim,)

    # Gather done by XLA (cheap, fusable) -> kernel is a pure streaming workload.
    x_i = jnp.take(descriptors, edges[0], axis=0).astype(jnp.float32)
    x_j = jnp.take(descriptors, edges[1], axis=0).astype(jnp.float32)

    # E tiling; pad rows with 1.0 so the log/div in the pad region stays finite
    # (padded rows are sliced away at the end).
    tile = max(8, min(int(tile_e), _round_up(n_edges, 8)))
    tile = _round_up(tile, 8)
    e_pad = _round_up(n_edges, tile)
    if e_pad != n_edges:
        pad_rows = ((0, e_pad - n_edges), (0, 0))
        x_i = jnp.pad(x_i, pad_rows, constant_values=1.0)
        x_j = jnp.pad(x_j, pad_rows, constant_values=1.0)

    # Lane-dense output: pad feature dim to a multiple of 128 (unmasked stores).
    out_pad = _round_up(out_dim, 128)
    if out_pad != out_dim:
        w3 = jnp.pad(w3, ((0, 0), (0, out_pad - out_dim)))
        b3 = jnp.pad(b3, (0, out_pad - out_dim))

    # bf16 weights for the MXU; biases stay f32 (added to the f32 accumulator).
    w1c = w1.astype(compute_dtype)
    w2c = w2.astype(compute_dtype)
    w3c = w3.astype(compute_dtype)
    b1r = b1.reshape(1, H1).astype(jnp.float32)
    b2r = b2.reshape(1, H2).astype(jnp.float32)
    b3r = b3.reshape(1, out_pad).astype(jnp.float32)

    grid = (e_pad // tile,)
    kernel = functools.partial(_fused_edge_mlp_kernel, compute_dtype=compute_dtype)

    out = pl.pallas_call(
        kernel,
        out_shape=jax.ShapeDtypeStruct((e_pad, out_pad), out_dtype),
        grid_spec=pltpu.PrefetchScalarGridSpec(
            num_scalar_prefetch=0,
            grid=grid,
            in_specs=[
                # Streamed per-tile inputs.
                pl.BlockSpec((tile, 8), lambda i: (i, 0)),
                pl.BlockSpec((tile, 8), lambda i: (i, 0)),
                # Weights/biases: constant index_map -> fetched once, VMEM-resident.
                pl.BlockSpec((8, H1), lambda i: (0, 0)),
                pl.BlockSpec((1, H1), lambda i: (0, 0)),
                pl.BlockSpec((H1, H2), lambda i: (0, 0)),
                pl.BlockSpec((1, H2), lambda i: (0, 0)),
                pl.BlockSpec((H2, out_pad), lambda i: (0, 0)),
                pl.BlockSpec((1, out_pad), lambda i: (0, 0)),
            ],
            out_specs=pl.BlockSpec((tile, out_pad), lambda i: (i, 0)),
        ),
        compiler_params=pltpu.CompilerParams(
            dimension_semantics=("parallel",),   # lets v7x shard E across its 2 TCs
            vmem_limit_bytes=48 << 20,           # safe on v7x (64 MiB/TC), ample elsewhere
        ),
    )(x_i, x_j, w1c, b1r, w2c, b2r, w3c, b3r)

    return out[:n_edges, :out_dim]


def edge_encoder_reference(descriptors, edges, w1, b1, w2, b2, w3, b3):
    """Pure-JAX f32 reference of the same forward pass (for correctness check)."""
    x_i = descriptors[edges[0]]
    x_j = descriptors[edges[1]]
    diff = x_i[:, 0:3] - x_j[:, 0:3]
    logr = jnp.log(x_i[:, 3:8] / x_j[:, 3:8])
    feat = jnp.concatenate([diff, logr], axis=1)
    h1 = jnp.maximum(feat @ w1 + b1, 0.0)
    h2 = jnp.maximum(h1 @ w2 + b2, 0.0)
    return h2 @ w3 + b3


if __name__ == "__main__":
    key = jax.random.PRNGKey(0)
    ks = jax.random.split(key, 9)

    n_nodes, n_edges, out_dim = 16, 64, 256  # edge_feature_dim = 256

    # Descriptors: channels 0:3 are centroid-like (any sign); channels 3:8 are
    # strictly positive size/std-like stats (required by the log-ratio).
    centroid = jax.random.normal(ks[0], (n_nodes, 3), jnp.float32)
    pos_part = jax.random.uniform(ks[1], (n_nodes, 5), jnp.float32,
                                  minval=0.5, maxval=2.0)
    descriptors = jnp.concatenate([centroid, pos_part], axis=1)

    edges = jax.random.randint(ks[2], (2, n_edges), 0, n_nodes, dtype=jnp.int32)

    # PointNet Conv1d(k=1) weights, already in [in, out] layout.
    w1 = 0.2 * jax.random.normal(ks[3], (8, H1), jnp.float32)
    b1 = 0.1 * jax.random.normal(ks[4], (H1,), jnp.float32)
    w2 = 0.1 * jax.random.normal(ks[5], (H1, H2), jnp.float32)
    b2 = 0.1 * jax.random.normal(ks[6], (H2,), jnp.float32)
    w3 = 0.1 * jax.random.normal(ks[7], (H2, out_dim), jnp.float32)
    b3 = 0.1 * jax.random.normal(ks[8], (out_dim,), jnp.float32)

    out = edge_encoder_2dssg(descriptors, edges, w1, b1, w2, b2, w3, b3)
    out = jax.block_until_ready(out)

    ref = edge_encoder_reference(descriptors, edges, w1, b1, w2, b2, w3, b3)
    assert out.shape == (n_edges, out_dim), out.shape
    rel_err = float(jnp.max(jnp.abs(out - ref)) / (jnp.max(jnp.abs(ref)) + 1e-6))
    assert rel_err < 5e-2, f"relative error too large: {rel_err}"

    print("KERNEL_OK")
</pallas_src>

<mosaic_0001>
module attributes {stable_mosaic.version = 11 : i64} {
  func.func @_fused_edge_mlp_kernel(%arg0: i32, %arg1: memref<64x8xf32, #tpu.memory_space<vmem>>, %arg2: memref<64x8xf32, #tpu.memory_space<vmem>>, %arg3: memref<8x64xbf16, #tpu.memory_space<vmem>>, %arg4: memref<1x64xf32, #tpu.memory_space<vmem>>, %arg5: memref<64x128xbf16, #tpu.memory_space<vmem>>, %arg6: memref<1x128xf32, #tpu.memory_space<vmem>>, %arg7: memref<128x256xbf16, #tpu.memory_space<vmem>>, %arg8: memref<1x256xf32, #tpu.memory_space<vmem>>, %arg9: memref<64x256xf32, #tpu.memory_space<vmem>>) attributes {dimension_semantics = [#tpu.dimension_semantics<parallel>], iteration_bounds = array<i64: 1>, scalar_prefetch = 0 : i64, scratch_operands = 0 : i64, tpu.core_type = #tpu.core_type<tc>, window_params = [{transform_indices = @transform_0, window_bounds = array<i64: 64, 8>}, {transform_indices = @transform_1, window_bounds = array<i64: 64, 8>}, {pipeline_mode = #tpu.pipeline_mode<synchronous>, transform_indices = @transform_2, window_bounds = array<i64: 8, 64>}, {pipeline_mode = #tpu.pipeline_mode<synchronous>, transform_indices = @transform_3, window_bounds = array<i64: 1, 64>}, {pipeline_mode = #tpu.pipeline_mode<synchronous>, transform_indices = @transform_4, window_bounds = array<i64: 64, 128>}, {pipeline_mode = #tpu.pipeline_mode<synchronous>, transform_indices = @transform_5, window_bounds = array<i64: 1, 128>}, {pipeline_mode = #tpu.pipeline_mode<synchronous>, transform_indices = @transform_6, window_bounds = array<i64: 128, 256>}, {pipeline_mode = #tpu.pipeline_mode<synchronous>, transform_indices = @transform_7, window_bounds = array<i64: 1, 256>}, {transform_indices = @transform_8, window_bounds = array<i64: 64, 256>}]} {
    %c0 = arith.constant 0 : index
    %c0_0 = arith.constant 0 : index
    %0 = vector.load %arg1[%c0, %c0_0] : memref<64x8xf32, #tpu.memory_space<vmem>>, vector<64x8xf32>
    %c0_1 = arith.constant 0 : index
    %c0_2 = arith.constant 0 : index
    %1 = vector.load %arg2[%c0_1, %c0_2] : memref<64x8xf32, #tpu.memory_space<vmem>>, vector<64x8xf32>
    %2 = tpu.iota {dimensions = array<i32: 1>} : vector<64x8xi32>
    %c3_i32 = arith.constant 3 : i32
    %3 = vector.broadcast %c3_i32 : i32 to vector<64x8xi32>
    %4 = arith.cmpi slt, %2, %3 : vector<64x8xi32>
    %5 = arith.subf %0, %1 : vector<64x8xf32>
    %6 = arith.divf %0, %1 : vector<64x8xf32>
    %7 = math.log %6 : vector<64x8xf32>
    %8 = arith.select %4, %5, %7 : vector<64x8xi1>, vector<64x8xf32>
    %9 = arith.truncf %8 : vector<64x8xf32> to vector<64x8xbf16>
    %c0_3 = arith.constant 0 : index
    %c0_4 = arith.constant 0 : index
    %10 = vector.load %arg3[%c0_3, %c0_4] : memref<8x64xbf16, #tpu.memory_space<vmem>>, vector<8x64xbf16>
    %cst = arith.constant dense<0.000000e+00> : vector<64x64xf32>
    %11 = tpu.matmul %9, %10, %cst {dimension_numbers = #tpu.dot_dimension_numbers<[1], [0], [0], [1], [0, 0, 1, 1], [], []>} : vector<64x8xbf16>, vector<8x64xbf16>, vector<64x64xf32> -> vector<64x64xf32>
    %c0_5 = arith.constant 0 : index
    %c0_6 = arith.constant 0 : index
    %12 = vector.load %arg4[%c0_5, %c0_6] : memref<1x64xf32, #tpu.memory_space<vmem>>, vector<1x64xf32>
    %13 = vector.broadcast %12 : vector<1x64xf32> to vector<64x64xf32>
    %14 = arith.addf %11, %13 : vector<64x64xf32>
    %cst_7 = arith.constant 0.000000e+00 : f32
    %15 = vector.broadcast %cst_7 : f32 to vector<64x64xf32>
    %16 = arith.maximumf %14, %15 : vector<64x64xf32>
    %17 = arith.truncf %16 : vector<64x64xf32> to vector<64x64xbf16>
    %c0_8 = arith.constant 0 : index
    %c0_9 = arith.constant 0 : index
    %18 = vector.load %arg5[%c0_8, %c0_9] : memref<64x128xbf16, #tpu.memory_space<vmem>>, vector<64x128xbf16>
    %cst_10 = arith.constant dense<0.000000e+00> : vector<64x128xf32>
    %19 = tpu.matmul %17, %18, %cst_10 {dimension_numbers = #tpu.dot_dimension_numbers<[1], [0], [0], [1], [0, 0, 1, 1], [], []>} : vector<64x64xbf16>, vector<64x128xbf16>, vector<64x128xf32> -> vector<64x128xf32>
    %c0_11 = arith.constant 0 : index
    %c0_12 = arith.constant 0 : index
    %20 = vector.load %arg6[%c0_11, %c0_12] : memref<1x128xf32, #tpu.memory_space<vmem>>, vector<1x128xf32>
    %21 = vector.broadcast %20 : vector<1x128xf32> to vector<64x128xf32>
    %22 = arith.addf %19, %21 : vector<64x128xf32>
    %cst_13 = arith.constant 0.000000e+00 : f32
    %23 = vector.broadcast %cst_13 : f32 to vector<64x128xf32>
    %24 = arith.maximumf %22, %23 : vector<64x128xf32>
    %25 = arith.truncf %24 : vector<64x128xf32> to vector<64x128xbf16>
    %c0_14 = arith.constant 0 : index
    %c0_15 = arith.constant 0 : index
    %26 = vector.load %arg7[%c0_14, %c0_15] : memref<128x256xbf16, #tpu.memory_space<vmem>>, vector<128x256xbf16>
    %cst_16 = arith.constant dense<0.000000e+00> : vector<64x256xf32>
    %27 = tpu.matmul %25, %26, %cst_16 {dimension_numbers = #tpu.dot_dimension_numbers<[1], [0], [0], [1], [0, 0, 1, 1], [], []>} : vector<64x128xbf16>, vector<128x256xbf16>, vector<64x256xf32> -> vector<64x256xf32>
    %c0_17 = arith.constant 0 : index
    %c0_18 = arith.constant 0 : index
    %28 = vector.load %arg8[%c0_17, %c0_18] : memref<1x256xf32, #tpu.memory_space<vmem>>, vector<1x256xf32>
    %29 = vector.broadcast %28 : vector<1x256xf32> to vector<64x256xf32>
    %30 = arith.addf %27, %29 : vector<64x256xf32>
    %c0_19 = arith.constant 0 : index
    %c0_20 = arith.constant 0 : index
    %31 = vector.load %arg9[%c0_19, %c0_20] : memref<64x256xf32, #tpu.memory_space<vmem>>, vector<64x256xf32>
    tpu.vector_store %arg9[%c0_19, %c0_20], %30 {strides = array<i32>} : memref<64x256xf32, #tpu.memory_space<vmem>>, vector<64x256xf32>,
    return
  }
  func.func @transform_0(%arg0: i32) -> (i32, i32) {
    %c0_i32 = arith.constant 0 : i32
    %c0_i32_0 = arith.constant 0 : i32
    return %arg0, %c0_i32 : i32, i32
  }
  func.func @transform_1(%arg0: i32) -> (i32, i32) {
    %c0_i32 = arith.constant 0 : i32
    %c0_i32_0 = arith.constant 0 : i32
    return %arg0, %c0_i32 : i32, i32
  }
  func.func @transform_2(%arg0: i32) -> (i32, i32) {
    %c0_i32 = arith.constant 0 : i32
    %c0_i32_0 = arith.constant 0 : i32
    %c0_i32_1 = arith.constant 0 : i32
    return %c0_i32, %c0_i32_0 : i32, i32
  }
  func.func @transform_3(%arg0: i32) -> (i32, i32) {
    %c0_i32 = arith.constant 0 : i32
    %c0_i32_0 = arith.constant 0 : i32
    %c0_i32_1 = arith.constant 0 : i32
    return %c0_i32, %c0_i32_0 : i32, i32
  }
  func.func @transform_4(%arg0: i32) -> (i32, i32) {
    %c0_i32 = arith.constant 0 : i32
    %c0_i32_0 = arith.constant 0 : i32
    %c0_i32_1 = arith.constant 0 : i32
    return %c0_i32, %c0_i32_0 : i32, i32
  }
  func.func @transform_5(%arg0: i32) -> (i32, i32) {
    %c0_i32 = arith.constant 0 : i32
    %c0_i32_0 = arith.constant 0 : i32
    %c0_i32_1 = arith.constant 0 : i32
    return %c0_i32, %c0_i32_0 : i32, i32
  }
  func.func @transform_6(%arg0: i32) -> (i32, i32) {
    %c0_i32 = arith.constant 0 : i32
    %c0_i32_0 = arith.constant 0 : i32
    %c0_i32_1 = arith.constant 0 : i32
    return %c0_i32, %c0_i32_0 : i32, i32
  }
  func.func @transform_7(%arg0: i32) -> (i32, i32) {
    %c0_i32 = arith.constant 0 : i32
    %c0_i32_0 = arith.constant 0 : i32
    %c0_i32_1 = arith.constant 0 : i32
    return %c0_i32, %c0_i32_0 : i32, i32
  }
  func.func @transform_8(%arg0: i32) -> (i32, i32) {
    %c0_i32 = arith.constant 0 : i32
    %c0_i32_0 = arith.constant 0 : i32
    return %arg0, %c0_i32 : i32, i32
  }
}

</mosaic_0001>

<bundles_post_ra>
// kernel: tpu_custom_call.1
= control target key start
LH: loop header
LB: loop body
LE: loop exit
PB: predicated region body
PF: predicated region fallthrough
CT: control target
= control target key end

     0   :  { %13 = vsyncpa [#allocation3], 0  ;;  %s974_s0 = inlined_call_operand.vmem [shape: f32[64,8], index: 0, kind: input, shape index: {}]   ;;  %s975_s1 = inlined_call_operand.vmem [shape: f32[64,8], index: 1, kind: input, shape index: {}]   ;;  %s976_s2 = inlined_call_operand.vmem [shape: bf16[8,64], index: 2, kind: input, shape index: {}]   ;;  %s977_s3 = inlined_call_operand.vmem [shape: f32[1,64], index: 3, kind: input, shape index: {}]   ;;  %s978_s4 = inlined_call_operand.hbm [shape: bf16[64,128], index: 4, kind: input, shape index: {}]   ;;  %s979_s5 = inlined_call_operand.vmem [shape: f32[1,128], index: 5, kind: input, shape index: {}]   ;;  %s980_s6 = inlined_call_operand.vmem [shape: bf16[128,256], index: 6, kind: input, shape index: {}]   ;;  %s981_s7 = inlined_call_operand.vmem [shape: f32[1,256], index: 7, kind: input, shape index: {}]   ;;  %s982_s8 = inlined_call_operand.hbm [shape: f32[64,256], index: 8, kind: output, shape index: {}]  }
   0x1   :  { %14 = vsyncpa [#allocation4], 0  ;;  %s758_s27 = smov [#allocation2]  }
   0x2   :  { %s28_s28 = sshll.u32 %s758_s27, 4  ;;  %s29_s28 = int_to_ptr.vmem [resolvable:$true] %s28_s28 }
   0x3   :  { %s722_s29 = scalar_lea.vmem %s29_s28, 512  ;;  %p727_p1 = scmp.lt.s32.totalorder %s29_s28, %s29_s28 }
   0x4   :  { %p723_p0 = scmp.ne.s32.totalorder %s29_s28, %s722_s29  ;;  %p728_p2 = scmp.lt.s32.totalorder %s722_s29, %s722_s29 }
   0x6   :  { %p729_p3 = por %p728_p2, %p727_p1 }
   0x8   :  { %p730_p4 = pnand %p729_p3, %p723_p0 }
   0xa   :  { %733 = shalt.err (!%p730_p4)
}
   0xb   :  { %s759_s30 = smov 64   ;;  %s760_s9 = smov 4  }
   0xc   :  { %34 = dma.hbm_to_vmem [thread:$0]  %s978_s4, 512, %s29_s28, [#allocation3], %s759_s30, %s759_s30, %s760_s9  }
   0xd   :  { %754 = dma.done.wait [#allocation3], 512  }
   0xe   :  { %755 = vsyncadd [#allocation3], 4294966784  ;;  %vm137_vm0 = vcmask 1043456   ;;  %v116_v0 = vld [vmem:[%s976_s2] sm:$0xf]  ;;  %v824_v3 = vld [vmem:[%s975_s1 + $0x8] sm:$0xff]  ;;  %v61_v34 = vlaneseq }
   0xf   :  { %646 = vmatprep.subr.msk.bf16.mxu0 %vm137_vm0, %v116_v0  ;;  %v139_v1 = vsel %vm137_vm0, %v116_v0, 0  ;;  %v819_v2 = vld [vmem:[%s975_s1] sm:$0xff]  ;;  %v830_v4 = vld [vmem:[%s975_s1 + $0x10] sm:$0xff]  ;;  %v836_v5 = vld [vmem:[%s975_s1 + $0x18] sm:$0xff]  ;;  %vm124_vm2 = vcmask 64512   ;;  %vm257_vm3 = vcmask 523264  }
  0x10   :  { %605 = vmatpush3.bf16.msra.mxu0 %v139_v1  ;;  %682 = vrcp.f32 %v819_v2  ;;  %v842_v6 = vld [vmem:[%s975_s1 + $0x20] sm:$0xff]  ;;  %v847_v7 = vld [vmem:[%s975_s1 + $0x28] sm:$0xff]  ;;  %v853_v8 = vld [vmem:[%s975_s1 + $0x30] sm:$0xff]  ;;  %v62_v36 = vand.u32 127, %v61_v34 }
  0x11   :  { %684 = vrcp.f32 %v824_v3  ;;  %v858_v9 = vld [vmem:[%s975_s1 + $0x38] sm:$0xff]  ;;  %v45_v11 = vld [vmem:[%s974_s0] sm:$0xff]  ;;  %v46_v12 = vld [vmem:[%s974_s0 + $0x8] sm:$0xff] }
  0x12   :  { %686 = vrcp.f32 %v830_v4  ;;  %v654_v10 = vld [vmem:[#allocation2 + $0x18] sm:$0xff]   ;;  %v47_v14 = vld [vmem:[%s974_s0 + $0x10] sm:$0xff]  ;;  %v49_v20 = vld [vmem:[%s974_s0 + $0x20] sm:$0xff]  ;;  %v64_v37 = vsub.f32 %v45_v11, %v819_v2  ;;  %vm63_vm1 = vcmp.lt.s32.totalorder %v62_v36, 3  ;;  %v65_v39 = vsub.f32 %v46_v12, %v824_v3 }
  0x13   :  { %688 = vrcp.f32 %v836_v5  ;;  %614 = vmatprep.subr.bf16.mxu1 %v654_v10  ;;  %v48_v17 = vld [vmem:[%s974_s0 + $0x18] sm:$0xff]  ;;  %v50_v23 = vld [vmem:[%s974_s0 + $0x28] sm:$0xff]  ;;  %v51_v26 = vld [vmem:[%s974_s0 + $0x30] sm:$0xff]  ;;  %v66_v42 = vsub.f32 %v47_v14, %v830_v4  ;;  %v68_v49 = vsub.f32 %v49_v20, %v842_v6 }
  0x14   :  { %690 = vrcp.f32 %v842_v6  ;;  %615 = vmatpush3.bf16.msra.mxu1 %v654_v10  ;;  %v52_v29 = vld [vmem:[%s974_s0 + $0x38] sm:$0xff]  ;;  %v67_v45 = vsub.f32 %v48_v17, %v836_v5  ;;  %v69_v53 = vsub.f32 %v50_v23, %v847_v7  ;;  %v70_v61 = vsub.f32 %v51_v26, %v853_v8  ;;  %v656_v10 = vld [vmem:[#allocation2 + $0x8] sm:$0xff]  }
  0x15   :  { %692 = vrcp.f32 %v847_v7  ;;  %v71_v62 = vsub.f32 %v52_v29, %v858_v9 }
  0x16   :  { %694 = vrcp.f32 %v853_v8 }
  0x17   :  { %696 = vrcp.f32 %v858_v9  ;;  %v655_v9 = vld [vmem:[#allocation2 + $0x10] sm:$0xff]  }
  0x18   :  { %616 = vmatprep.subr.bf16.mxu1 %v655_v9 }
  0x19   :  { %617 = vmatpush3.bf16.msra.mxu1 %v655_v9 }
  0x1a   :  { %618 = vmatprep.subr.bf16.mxu1 %v656_v10 }
  0x1d   :  { %v683_v13 = vpop.eup %682  ;;  %619 = vmatpush3.bf16.msra.mxu1 %v656_v10 }
  0x1e   :  { %v685_v15 = vpop.eup %684  ;;  %v73_v16 = vmul.f32 %v683_v13, %v45_v11  ;;  %v657_v11 = vld [vmem:[#allocation2] sm:$0xff]   ;;  %v660_v13 = vld [vmem:[%s980_s6 + $0x74] ss:$8 sps:$4 sm:$0xff]  }
  0x1f   :  { %v687_v18 = vpop.eup %686  ;;  %v75_v19 = vmul.f32 %v685_v15, %v46_v12  ;;  %620 = vmatprep.subr.bf16.mxu1 %v657_v11  ;;  %v658_v12 = vld [vmem:[%s980_s6 + $0x70] ss:$8 sps:$4 sm:$0xff]   ;;  %455 = vmatprep.subr.bf16.mxu0 %v660_v13  ;;  %v661_v15 = vld [vmem:[%s980_s6 + $0x60] ss:$8 sps:$4 sm:$0xff]  }
  0x20   :  { %v689_v21 = vpop.eup %688  ;;  %698 = vlog2.f32 %v73_v16  ;;  %v77_v22 = vmul.f32 %v687_v18, %v47_v14  ;;  %v663_v14 = vld [vmem:[%s980_s6 + $0x64] ss:$8 sps:$4 sm:$0xff]   ;;  %v666_v16 = vld [vmem:[%s980_s6 + $0x54] ss:$8 sps:$4 sm:$0xff]  }
  0x21   :  { %v691_v24 = vpop.eup %690  ;;  %700 = vlog2.f32 %v75_v19  ;;  %v79_v25 = vmul.f32 %v689_v21, %v48_v17  ;;  %621 = vmatpush3.bf16.msra.mxu1 %v657_v11  ;;  %v664_v17 = vld [vmem:[%s980_s6 + $0x50] ss:$8 sps:$4 sm:$0xff]   ;;  %v669_v18 = vld [vmem:[%s980_s6 + $0x44] ss:$8 sps:$4 sm:$0xff]   ;;  %v667_v19 = vld [vmem:[%s980_s6 + $0x40] ss:$8 sps:$4 sm:$0xff]  }
  0x22   :  { %v693_v27 = vpop.eup %692  ;;  %702 = vlog2.f32 %v77_v22  ;;  %v81_v28 = vmul.f32 %v691_v24, %v49_v20  ;;  %630 = vmatprep.subr.bf16.mxu1 %v660_v13  ;;  %v672_v20 = vld [vmem:[%s980_s6 + $0x34] ss:$8 sps:$4 sm:$0xff]   ;;  %v670_v21 = vld [vmem:[%s980_s6 + $0x30] ss:$8 sps:$4 sm:$0xff]   ;;  %v561_v24 = vld [vmem:[%s977_s3] ss:$0 sm:$0xff] }
  0x23   :  { %v695_v30 = vpop.eup %694  ;;  %704 = vlog2.f32 %v79_v25  ;;  %v83_v31 = vmul.f32 %v693_v27, %v50_v23 }
  0x24   :  { %v697_v32 = vpop.eup %696  ;;  %706 = vlog2.f32 %v81_v28  ;;  %v85_v33 = vmul.f32 %v695_v30, %v51_v26 }
  0x25   :  { %708 = vlog2.f32 %v83_v31  ;;  %v87_v35 = vmul.f32 %v697_v32, %v52_v29 }
  0x26   :  { %710 = vlog2.f32 %v85_v33 }
  0x27   :  { %712 = vlog2.f32 %v87_v35 }
  0x2d   :  { %v699_v38 = vpop.eup %698 }
  0x2e   :  { %v701_v40 = vpop.eup %700  ;;  %v89_v41 = vmul.f32 0.6931472, %v699_v38 }
  0x2f   :  { %v703_v43 = vpop.eup %702  ;;  %v91_v44 = vmul.f32 0.6931472, %v701_v40 }
  0x30   :  { %v705_v46 = vpop.eup %704  ;;  %v104_v47 = vsel %vm63_vm1, %v64_v37, %v89_v41  ;;  %v93_v48 = vmul.f32 0.6931472, %v703_v43 }
  0x31   :  { %v707_v50 = vpop.eup %706  ;;  %v105_v51 = vsel %vm63_vm1, %v65_v39, %v91_v44  ;;  %v95_v52 = vmul.f32 0.6931472, %v705_v46 }
  0x32   :  { %v709_v54 = vpop.eup %708  ;;  %v112_v55 = vpack.c.bf16 %v105_v51, %v104_v47  ;;  %v106_v56 = vsel %vm63_vm1, %v66_v42, %v93_v48  ;;  %v97_v57 = vmul.f32 0.6931472, %v707_v50 }
  0x33   :  { %v711_v58 = vpop.eup %710  ;;  %v107_v59 = vsel %vm63_vm1, %v67_v45, %v95_v52  ;;  %v99_v60 = vmul.f32 0.6931472, %v709_v54  ;;  %v675_v52 = vld [vmem:[%s980_s6 + $0x24] ss:$8 sps:$4 sm:$0xff]   ;;  %v678_v54 = vld [vmem:[%s980_s6 + $0x14] ss:$8 sps:$4 sm:$0xff]  }
  0x34   :  { %v713_v63 = vpop.eup %712  ;;  %606 = vmatprep.mubr.msk.bf16.mxu0 %vm124_vm2, %v112_v55  ;;  %v113_v0 = vpack.c.bf16 %v107_v59, %v106_v56  ;;  %v108_v1 = vsel %vm63_vm1, %v68_v49, %v97_v57  ;;  %v101_v2 = vmul.f32 0.6931472, %v711_v58  ;;  %v676_v55 = vld [vmem:[%s980_s6 + $0x10] ss:$8 sps:$4 sm:$0xff]   ;;  %v681_v56 = vld [vmem:[%s980_s6 + $0x4] ss:$8 sps:$4 sm:$0xff]  }
  0x35   :  { %v109_v3 = vsel %vm63_vm1, %v69_v53, %v99_v60  ;;  %v103_v4 = vmul.f32 0.6931472, %v713_v63  ;;  %v673_v53 = vld [vmem:[%s980_s6 + $0x20] ss:$8 sps:$4 sm:$0xff]   ;;  %v761_v58 = vmov 0  }
  0x36   :  { %607 = vmatmul.mubr.msk.bf16.vlgmr.msra.gmra.mxu0 %vm124_vm2, %v113_v0  ;;  %v114_v5 = vpack.c.bf16 %v109_v3, %v108_v1  ;;  %v110_v6 = vsel %vm63_vm1, %v70_v61, %v101_v2  ;;  %v679_v57 = vld [vmem:[%s980_s6] ss:$8 sps:$4 sm:$0xff]  }
  0x37   :  { %v111_v7 = vsel %vm63_vm1, %v71_v62, %v103_v4  ;;  %456 = vmatpush1.bf16.msra.mxu0 %v658_v12  ;;  %v566_v61 = vld [vmem:[%s979_s5] ss:$0 sm:$0xff] }
  0x38   :  { %610 = vmatprep.mubr.msk.bf16.mxu0 %vm124_vm2, %v114_v5  ;;  %v115_v8 = vpack.c.bf16 %v111_v7, %v110_v6  ;;  %457 = vmatprep.subr.bf16.mxu0 %v663_v14 }
  0x3b   :  { %458 = vmatpush1.bf16.msra.mxu0 %v661_v15 }
  0x3c   :  { %459 = vmatprep.subr.bf16.mxu0 %v666_v16 }
  0x3e   :  { %611 = vmatmul.mubr.msk.bf16.gmra.mxu0 %vm124_vm2, %v115_v8 }
  0x3f   :  { %460 = vmatpush1.bf16.msra.mxu0 %v664_v17  ;;  %487 = vmatprep.mubr.bf16.mxu0 %v761_v58 }
  0x40   :  { %461 = vmatprep.subr.bf16.mxu0 %v669_v18 }
  0x43   :  { %462 = vmatpush1.bf16.msra.mxu0 %v667_v19 }
  0x44   :  { %463 = vmatprep.subr.bf16.mxu0 %v672_v20 }
  0x47   :  { %464 = vmatpush1.bf16.msra.mxu0 %v670_v21 }
  0x48   :  { %465 = vmatprep.subr.bf16.mxu0 %v675_v52 }
  0x4b   :  { %466 = vmatpush1.bf16.msra.mxu0 %v673_v53 }
  0x4c   :  { %467 = vmatprep.subr.bf16.mxu0 %v678_v54 }
  0x4f   :  { %468 = vmatpush1.bf16.msra.mxu0 %v676_v55 }
  0x50   :  { %469 = vmatprep.subr.bf16.mxu0 %v681_v56 }
  0x53   :  { %470 = vmatpush1.bf16.msra.mxu0 %v679_v57 }
  0xf6   :  { %v608_v22 = vpop.f32.mrf.mxu0 }
  0xf7   :  { %v184_v28 = vadd.f32 %v608_v22, %v561_v24 }
  0xf8   :  { %v175_v23 = vpop.f32.mrf.mxu0 }
  0xf9   :  { %v176_v26 = vadd.f32 %v561_v24, %v175_v23  ;;  %v208_v36 = vmax.f32 %v184_v28, 0.0 }
  0xfa   :  { %v609_v25 = vpop.f32.mrf.mxu0 }
  0xfb   :  { %v187_v27 = vadd.f32 %v609_v25, %v561_v24  ;;  %v206_v33 = vmax.f32 %v176_v26, 0.0  ;;  %v363_v26 = vld [vmem:[%s981_s7] sm:$0x3]  ;;  %s762_s7 = smov [#allocation5]  }
  0xfc   :  { %v178_v29 = vpop.f32.mrf.mxu0  ;;  %s549_s27 = sshll.u32 %s762_s7, 4  ;;  %s550_s27 = int_to_ptr.vmem [resolvable:$true] %s549_s27 }
  0xfd   :  { %v179_v30 = vadd.f32 %v561_v24, %v178_v29  ;;  %v209_v31 = vmax.f32 %v187_v27, 0.0  ;;  %s734_s28 = scalar_lea.vmem %s550_s27, 2048  ;;  %p739_p6 = scmp.lt.s32.totalorder %s550_s27, %s550_s27 }
  0xfe   :  { %v612_v32 = vpop.f32.mrf.mxu0  ;;  %p735_p5 = scmp.ne.s32.totalorder %s550_s27, %s734_s28  ;;  %p740_p7 = scmp.lt.s32.totalorder %s734_s28, %s734_s28 }
  0xff   :  { %v207_v35 = vmax.f32 %v179_v30, 0.0  ;;  %v200_v37 = vadd.f32 %v612_v32, %v561_v24  ;;  %v215_v41 = vpack.c.bf16 %v209_v31, %v208_v36 }
 0x100   :  { %v191_v38 = vpop.f32.mrf.mxu0  ;;  %p741_p8 = por %p740_p7, %p739_p6 }
 0x101   :  { %v192_v39 = vadd.f32 %v561_v24, %v191_v38  ;;  %v214_v40 = vpack.c.bf16 %v207_v35, %v206_v33  ;;  %v212_v44 = vmax.f32 %v200_v37, 0.0 }
 0x102   :  { %v613_v42 = vpop.f32.mrf.mxu0  ;;  %p742_p9 = pnand %p741_p8, %p735_p5 }
 0x103   :  { %v203_v43 = vadd.f32 %v613_v42, %v561_v24  ;;  %622 = vmatprep.mubr.msk.bf16.mxu1 %vm257_vm3, %v214_v40  ;;  %v210_v46 = vmax.f32 %v192_v39, 0.0 }
 0x104   :  { %v194_v45 = vpop.f32.mrf.mxu0  ;;  %623 = vmatmul.mubr.msk.bf16.vlgmr.msra.gmra.mxu1 %vm257_vm3, %v215_v41 }
 0x105   :  { %v213_v47 = vmax.f32 %v203_v43, 0.0  ;;  %v195_v48 = vadd.f32 %v561_v24, %v194_v45  ;;  %638 = vmatpush1.bf16.msra.mxu1 %v658_v12  ;;  %v366_v24 = vshrl.u32 %v61_v34, 7 }
 0x106   :  { %631 = vmatprep.subr.bf16.mxu1 %v663_v14 }
 0x107   :  { %v211_v49 = vmax.f32 %v195_v48, 0.0  ;;  %v217_v50 = vpack.c.bf16 %v213_v47, %v212_v44  ;;  %v367_v25 = vsub.s32 0, %v366_v24  ;;  %v371_v27 = vsub.s32 1, %v366_v24 }
 0x109   :  { %v216_v51 = vpack.c.bf16 %v211_v49, %v210_v46  ;;  %639 = vmatpush1.bf16.msra.mxu1 %v661_v15  ;;  %v368_v28 = vrot.slane %v363_v26, %v367_v25  ;;  %v372_v29 = vrot.slane %v363_v26, %v371_v27 }
 0x10a   :  { %632 = vmatprep.subr.bf16.mxu1 %v666_v16 }
 0x10b   :  { %626 = vmatprep.mubr.msk.bf16.mxu1 %vm257_vm3, %v216_v51 }
 0x10c   :  { %627 = vmatmul.mubr.msk.bf16.gmra.mxu1 %vm257_vm3, %v217_v50 }
 0x10d   :  { %640 = vmatpush1.bf16.msra.mxu1 %v664_v17  ;;  %517 = vmatprep.mubr.bf16.mxu1 %v761_v58 }
 0x10e   :  { %633 = vmatprep.subr.bf16.mxu1 %v669_v18 }
 0x111   :  { %641 = vmatpush1.bf16.msra.mxu1 %v667_v19 }
 0x112   :  { %634 = vmatprep.subr.bf16.mxu1 %v672_v20 }
 0x115   :  { %642 = vmatpush1.bf16.msra.mxu1 %v670_v21 }
 0x116   :  { %635 = vmatprep.subr.bf16.mxu1 %v675_v52 }
 0x119   :  { %643 = vmatpush1.bf16.msra.mxu1 %v673_v53 }
 0x11a   :  { %636 = vmatprep.subr.bf16.mxu1 %v678_v54 }
 0x11d   :  { %644 = vmatpush1.bf16.msra.mxu1 %v676_v55 }
 0x11e   :  { %637 = vmatprep.subr.bf16.mxu1 %v681_v56 }
 0x121   :  { %645 = vmatpush1.bf16.msra.mxu1 %v679_v57 }
 0x1c4   :  { %v624_v59 = vpop.f32.mrf.mxu1 }
 0x1c5   :  { %v313_v10 = vadd.f32 %v624_v59, %v566_v61 }
 0x1c6   :  { %v304_v60 = vpop.f32.mrf.mxu1 }
 0x1c7   :  { %v305_v63 = vadd.f32 %v566_v61, %v304_v60  ;;  %v337_v16 = vmax.f32 %v313_v10, 0.0 }
 0x1c8   :  { %v625_v62 = vpop.f32.mrf.mxu1 }
 0x1c9   :  { %v335_v3 = vmax.f32 %v305_v63, 0.0  ;;  %v316_v6 = vadd.f32 %v625_v62, %v566_v61 }
 0x1ca   :  { %v307_v0 = vpop.f32.mrf.mxu1 }
 0x1cb   :  { %v308_v1 = vadd.f32 %v566_v61, %v307_v0  ;;  %v338_v12 = vmax.f32 %v316_v6, 0.0 }
 0x1cc   :  { %v628_v2 = vpop.f32.mrf.mxu1 }
 0x1cd   :  { %v336_v4 = vmax.f32 %v308_v1, 0.0  ;;  %v329_v8 = vadd.f32 %v628_v2, %v566_v61  ;;  %v344_v18 = vpack.c.bf16 %v338_v12, %v337_v16 }
 0x1ce   :  { %v320_v5 = vpop.f32.mrf.mxu1 }
 0x1cf   :  { %v343_v7 = vpack.c.bf16 %v336_v4, %v335_v3  ;;  %v341_v13 = vmax.f32 %v329_v8, 0.0  ;;  %v321_v20 = vadd.f32 %v566_v61, %v320_v5 }
 0x1d0   :  { %v629_v9 = vpop.f32.mrf.mxu1 }
 0x1d1   :  { %v332_v11 = vadd.f32 %v629_v9, %v566_v61  ;;  %488 = vmatmul.mubr.bf16.vlgmr.msra.gmra.mxu0 %v343_v7  ;;  %v339_v22 = vmax.f32 %v321_v20, 0.0 }
 0x1d2   :  { %497 = vmatprep.mubr.bf16.mxu0 %v761_v58  ;;  %v323_v15 = vpop.f32.mrf.mxu1 }
 0x1d3   :  { %v342_v14 = vmax.f32 %v332_v11, 0.0  ;;  %v324_v19 = vadd.f32 %v566_v61, %v323_v15 }
 0x1d5   :  { %v346_v17 = vpack.c.bf16 %v342_v14, %v341_v13  ;;  %v340_v21 = vmax.f32 %v324_v19, 0.0 }
 0x1d7   :  { %518 = vmatmul.mubr.bf16.vlgmr.msra.gmra.mxu1 %v346_v17  ;;  %v345_v23 = vpack.c.bf16 %v340_v21, %v339_v22 }
 0x1d9   :  { %498 = vmatmul.mubr.bf16.gmra.mxu0 %v344_v18 }
 0x1da   :  { %507 = vmatprep.mubr.bf16.mxu0 %v761_v58 }
 0x1e1   :  { %508 = vmatmul.mubr.bf16.gmra.mxu0 %v345_v23 }
 0x291   :  { %v489_v30 = vpop.f32.mrf.mxu0 }
 0x292   :  { %v490_v31 = vadd.f32 %v489_v30, %v368_v28 }
 0x293   :  { %v491_v32 = vpop.f32.mrf.mxu0 }
 0x294   :  { %528 = vst [vmem:[#allocation5] sm:$0xff] %v490_v31  ;;  %v492_v33 = vadd.f32 %v491_v32, %v372_v29 }
 0x295   :  { %v493_v35 = vpop.f32.mrf.mxu0 }
 0x296   :  { %529 = vst [vmem:[#allocation5 + $0x8] sm:$0xff] %v492_v33  ;;  %v494_v36 = vadd.f32 %v493_v35, %v368_v28 }
 0x297   :  { %v495_v37 = vpop.f32.mrf.mxu0  ;;  %v519_v38 = vpop.f32.mrf.mxu1 }
 0x298   :  { %530 = vst [vmem:[#allocation5 + $0x10] sm:$0xff] %v494_v36  ;;  %v496_v34 = vadd.f32 %v495_v37, %v372_v29  ;;  %v520_v39 = vadd.f32 %v519_v38, %v368_v28 }
 0x299   :  { %v499_v40 = vpop.f32.mrf.mxu0  ;;  %v521_v41 = vpop.f32.mrf.mxu1 }
 0x29a   :  { %531 = vst [vmem:[#allocation5 + $0x18] sm:$0xff] %v496_v34  ;;  %540 = vst [vmem:[#allocation5 + $0x60] sm:$0xff] %v520_v39  ;;  %v500_v42 = vadd.f32 %v499_v40, %v368_v28  ;;  %v522_v43 = vadd.f32 %v521_v41, %v372_v29 }
 0x29b   :  { %v501_v44 = vpop.f32.mrf.mxu0  ;;  %v523_v45 = vpop.f32.mrf.mxu1 }
 0x29c   :  { %532 = vst [vmem:[#allocation5 + $0x20] sm:$0xff] %v500_v42  ;;  %541 = vst [vmem:[#allocation5 + $0x68] sm:$0xff] %v522_v43  ;;  %v502_v46 = vadd.f32 %v501_v44, %v372_v29  ;;  %v524_v47 = vadd.f32 %v523_v45, %v368_v28 }
 0x29d   :  { %v503_v48 = vpop.f32.mrf.mxu0  ;;  %v525_v49 = vpop.f32.mrf.mxu1 }
 0x29e   :  { %533 = vst [vmem:[#allocation5 + $0x28] sm:$0xff] %v502_v46  ;;  %542 = vst [vmem:[#allocation5 + $0x70] sm:$0xff] %v524_v47  ;;  %v504_v50 = vadd.f32 %v503_v48, %v368_v28  ;;  %v526_v51 = vadd.f32 %v525_v49, %v372_v29 }
 0x29f   :  { %v505_v52 = vpop.f32.mrf.mxu0 }
 0x2a0   :  { %534 = vst [vmem:[#allocation5 + $0x30] sm:$0xff] %v504_v50  ;;  %543 = vst [vmem:[#allocation5 + $0x78] sm:$0xff] %v526_v51  ;;  %v506_v53 = vadd.f32 %v505_v52, %v372_v29 }
 0x2a1   :  { %v509_v54 = vpop.f32.mrf.mxu0 }
 0x2a2   :  { %535 = vst [vmem:[#allocation5 + $0x38] sm:$0xff] %v506_v53  ;;  %v510_v55 = vadd.f32 %v509_v54, %v368_v28 }
 0x2a3   :  { %v511_v56 = vpop.f32.mrf.mxu0 }
 0x2a4   :  { %536 = vst [vmem:[#allocation5 + $0x40] sm:$0xff] %v510_v55  ;;  %v512_v57 = vadd.f32 %v511_v56, %v372_v29 }
 0x2a5   :  { %v513_v58 = vpop.f32.mrf.mxu0 }
 0x2a6   :  { %537 = vst [vmem:[#allocation5 + $0x48] sm:$0xff] %v512_v57  ;;  %v514_v59 = vadd.f32 %v513_v58, %v368_v28 }
 0x2a7   :  { %v515_v60 = vpop.f32.mrf.mxu0 }
 0x2a8   :  { %538 = vst [vmem:[#allocation5 + $0x50] sm:$0xff] %v514_v59  ;;  %v516_v61 = vadd.f32 %v515_v60, %v372_v29 }
 0x2aa   :  { %539 = vst [vmem:[#allocation5 + $0x58] sm:$0xff] %v516_v61 }
 0x2ab   :  { %745 = shalt.err (!%p742_p9)
}
 0x2ac   :  { %s763_s29 = smov 256   ;;  %s764_s30 = smov 16  }
 0x2ad   :  { %555 = dma.vmem_to_hbm [thread:$0]  %s550_s27, 2048, %s982_s8, [#allocation4], %s763_s29, %s763_s29, %s764_s30  }
 0x2ae   :  { %756 = dma.done.wait [#allocation4], 2048  }
 0x2af   :  { %757 = vsyncadd [#allocation4], 4294965248 }
 0x2b0   :  { %559 = vsyncpa [#allocation3], 1 }
 0x2b1   :  { %560 = vsyncpa [#allocation4], 1 }

</bundles_post_ra>
